<compile_context>
chip_gen: v5e
topology: v5e:2x2
jax: 0.10.0
libtpu: 0.0.40
codegen_flags: <defaults>
</compile_context>

<pallas_src>
import functools

import jax
import jax.numpy as jnp
from jax import lax
from jax.experimental import pallas as pl
from jax.experimental.pallas import tpu as pltpu

_OUT_SUB = 8
_OUT_LANE = 128


def _soft_ce_kernel(x_ref, t_ref, out_ref, *, n_valid):
    # x_ref, t_ref: (TN, C) tiles in native dtype; out_ref: (1, 8, 128) partial-sum block.
    x = x_ref[...].astype(jnp.float32)
    t = t_ref[...].astype(jnp.float32)
    tn = x.shape[0]

    m = jnp.max(x, axis=1, keepdims=True)
    lse = jnp.log(jnp.sum(jnp.exp(x - m), axis=1, keepdims=True)) + m   # (TN, 1)
    t_sum = jnp.sum(t, axis=1, keepdims=True)                           # (TN, 1)
    tx = jnp.sum(t * x, axis=1, keepdims=True)                          # (TN, 1)
    per_row = lse * t_sum - tx                                          # (TN, 1)

    # Mask rows past the true batch size (ragged last tile reads garbage there);
    # select (not multiply) so garbage NaN/Inf cannot propagate.
    row = pl.program_id(0) * tn + lax.broadcasted_iota(jnp.int32, (tn, 1), 0)
    per_row = jnp.where(row < n_valid, per_row, 0.0)
    out_ref[...] = jnp.broadcast_to(jnp.sum(per_row), (1, _OUT_SUB, _OUT_LANE))


def _hard_ce_kernel(x_ref, lbl_ref, out_ref, *, n_valid):
    # x_ref: (TN, C); lbl_ref: (TN, 1) int32 labels; out_ref: (1, 8, 128).
    x = x_ref[...].astype(jnp.float32)
    lbl = lbl_ref[...]
    tn, c = x.shape

    m = jnp.max(x, axis=1, keepdims=True)
    lse = jnp.log(jnp.sum(jnp.exp(x - m), axis=1, keepdims=True)) + m   # (TN, 1)
    cls = lax.broadcasted_iota(jnp.int32, (tn, c), 1)
    picked = jnp.sum(jnp.where(cls == lbl, x, 0.0), axis=1, keepdims=True)  # x[i, lbl_i]
    per_row = lse - picked                                              # (TN, 1)

    row = pl.program_id(0) * tn + lax.broadcasted_iota(jnp.int32, (tn, 1), 0)
    per_row = jnp.where(row < n_valid, per_row, 0.0)
    out_ref[...] = jnp.broadcast_to(jnp.sum(per_row), (1, _OUT_SUB, _OUT_LANE))


def _min_sublane(dtype):
    # Packed sublane granularity: f32 -> 8, bf16 -> 16, int8/fp8 -> 32.
    return max(8, 32 // jnp.dtype(dtype).itemsize)


def cutmix_cross_entropy_loss(logits, target, size_average=True,
                              max_tile=1024, vmem_stream_budget=24 << 20):
    """logits: (N, C); target: (N, C) soft labels (any float dtype) or (N,) int labels."""
    N, C = logits.shape
    hard = target.ndim == 1

    x_row = C * jnp.dtype(logits.dtype).itemsize
    if hard:
        t_row_vmem = _OUT_LANE * 4            # (tn, 1) int32 block is lane-padded in VMEM
        f32_row = 2 * C * 4                   # x_f32 + exp temp
        align = _min_sublane(logits.dtype)
    else:
        t_row_vmem = C * jnp.dtype(target.dtype).itemsize
        f32_row = 3 * C * 4                   # x_f32, t_f32/product, exp temp
        align = max(_min_sublane(logits.dtype), _min_sublane(target.dtype))
    per_row = 2 * (x_row + t_row_vmem) + f32_row   # double-buffered streams + f32 work

    # Largest batch tile whose VMEM footprint fits the budget (safe on v7x's 64 MiB too).
    tn = int(vmem_stream_budget // max(per_row, 1))
    tn = max(align, min(max_tile, (tn // align) * align))
    if tn >= N:
        tn = N                                # single tile covering the full batch dim
    num_tiles = (N + tn - 1) // tn

    if hard:
        t_arg = target.astype(jnp.int32).reshape(N, 1)
        kernel = functools.partial(_hard_ce_kernel, n_valid=N)
        t_spec = pl.BlockSpec((tn, 1), lambda i: (i, 0))
    else:
        t_arg = target
        kernel = functools.partial(_soft_ce_kernel, n_valid=N)
        t_spec = pl.BlockSpec((tn, C), lambda i: (i, 0))

    vmem_bytes = tn * per_row + 2 * _OUT_SUB * _OUT_LANE * 4 + (4 << 20)
    vmem_bytes = int(min(max(vmem_bytes, 16 << 20), 56 << 20))

    partials = pl.pallas_call(
        kernel,
        out_shape=jax.ShapeDtypeStruct((num_tiles, _OUT_SUB, _OUT_LANE), jnp.float32),
        grid=(num_tiles,),
        in_specs=[
            pl.BlockSpec((tn, C), lambda i: (i, 0)),
            t_spec,
        ],
        out_specs=pl.BlockSpec((1, _OUT_SUB, _OUT_LANE), lambda i: (i, 0, 0)),
        compiler_params=pltpu.CompilerParams(
            dimension_semantics=("parallel",),   # independent tiles; v7x shards across both TCs
            vmem_limit_bytes=vmem_bytes,
        ),
    )(logits, t_arg)

    total = jnp.sum(partials[:, 0, 0])
    # TODO(synk): for very large class counts (C >~ 32k) add a class-axis grid with an
    # online (flash-style) running max / running sum-exp instead of keeping full C resident.
    if size_average:
        return total / jnp.float32(N)
    return total


def _reference(logits, target, size_average=True):
    logits = logits.astype(jnp.float32)
    if target.ndim == 1:
        target = jax.nn.one_hot(target, logits.shape[-1], dtype=jnp.float32)
    logp = jax.nn.log_softmax(logits, axis=1)
    per_row = jnp.sum(-target.astype(jnp.float32) * logp, axis=1)
    return jnp.mean(per_row) if size_average else jnp.sum(per_row)


if __name__ == "__main__":
    key = jax.random.PRNGKey(0)
    k1, k2, k3, k4, k5 = jax.random.split(key, 5)

    # small shapes consistent with the module: (batch, classes)
    N, C = 16, 32
    logits = jax.random.normal(k1, (N, C), dtype=jnp.float32) * 2.0
    soft_t = jax.nn.softmax(jax.random.normal(k2, (N, C), dtype=jnp.float32), axis=1)
    hard_t = jax.random.randint(k3, (N,), 0, C)

    out_soft_mean = jax.block_until_ready(cutmix_cross_entropy_loss(logits, soft_t, True))
    out_soft_sum = jax.block_until_ready(cutmix_cross_entropy_loss(logits, soft_t, False))
    out_hard_mean = jax.block_until_ready(cutmix_cross_entropy_loss(logits, hard_t, True))
    out_hard_sum = jax.block_until_ready(cutmix_cross_entropy_loss(logits, hard_t, False))

    assert jnp.allclose(out_soft_mean, _reference(logits, soft_t, True), rtol=1e-5, atol=1e-5)
    assert jnp.allclose(out_soft_sum, _reference(logits, soft_t, False), rtol=1e-5, atol=1e-5)
    assert jnp.allclose(out_hard_mean, _reference(logits, hard_t, True), rtol=1e-5, atol=1e-5)
    assert jnp.allclose(out_hard_sum, _reference(logits, hard_t, False), rtol=1e-5, atol=1e-5)

    # single-tile ragged batch (N not a multiple of 8, full-dim block, no padding copy)
    N2, C2 = 10, 33
    logits2 = jax.random.normal(k4, (N2, C2), dtype=jnp.float32) * 2.0
    soft_t2 = jax.nn.softmax(jax.random.normal(k2, (N2, C2), dtype=jnp.float32), axis=1)
    hard_t2 = jax.random.randint(k3, (N2,), 0, C2)
    out2_soft = jax.block_until_ready(cutmix_cross_entropy_loss(logits2, soft_t2, True))
    out2_hard = jax.block_until_ready(cutmix_cross_entropy_loss(logits2, hard_t2, False))
    assert jnp.allclose(out2_soft, _reference(logits2, soft_t2, True), rtol=1e-5, atol=1e-5)
    assert jnp.allclose(out2_hard, _reference(logits2, hard_t2, False), rtol=1e-5, atol=1e-5)

    # multi-tile ragged batch + bf16 native-dtype streaming (exercises in-kernel row mask)
    N3, C3 = 40, 33
    logits3 = (jax.random.normal(k5, (N3, C3), dtype=jnp.float32) * 2.0).astype(jnp.bfloat16)
    soft_t3 = jax.nn.softmax(
        jax.random.normal(k2, (N3, C3), dtype=jnp.float32), axis=1).astype(jnp.bfloat16)
    hard_t3 = jax.random.randint(k3, (N3,), 0, C3)
    out3_soft = jax.block_until_ready(
        cutmix_cross_entropy_loss(logits3, soft_t3, True, max_tile=16))
    out3_hard = jax.block_until_ready(
        cutmix_cross_entropy_loss(logits3, hard_t3, False, max_tile=16))
    ref3_soft = _reference(logits3.astype(jnp.float32), soft_t3.astype(jnp.float32), True)
    ref3_hard = _reference(logits3.astype(jnp.float32), hard_t3, False)
    assert jnp.allclose(out3_soft, ref3_soft, rtol=1e-4, atol=1e-4)
    assert jnp.allclose(out3_hard, ref3_hard, rtol=1e-4, atol=1e-3)

    print("KERNEL_OK")
</pallas_src>

<mosaic_0001>
module attributes {stable_mosaic.version = 11 : i64} {
  func.func @_soft_ce_kernel(%arg0: i32, %arg1: memref<16x32xf32, #tpu.memory_space<vmem>>, %arg2: memref<16x32xf32, #tpu.memory_space<vmem>>, %arg3: memref<1x8x128xf32, #tpu.memory_space<vmem>>) attributes {dimension_semantics = [#tpu.dimension_semantics<parallel>], iteration_bounds = array<i64: 1>, scalar_prefetch = 0 : i64, scratch_operands = 0 : i64, tpu.core_type = #tpu.core_type<tc>, window_params = [{transform_indices = @transform_0, window_bounds = array<i64: 16, 32>}, {transform_indices = @transform_1, window_bounds = array<i64: 16, 32>}, {transform_indices = @transform_2, window_bounds = array<i64: 1, 8, 128>}]} {
    %c0 = arith.constant 0 : index
    %c0_0 = arith.constant 0 : index
    %0 = vector.load %arg1[%c0, %c0_0] : memref<16x32xf32, #tpu.memory_space<vmem>>, vector<16x32xf32>
    %c0_1 = arith.constant 0 : index
    %c0_2 = arith.constant 0 : index
    %1 = vector.load %arg2[%c0_1, %c0_2] : memref<16x32xf32, #tpu.memory_space<vmem>>, vector<16x32xf32>
    %cst = arith.constant dense<0xFF800000> : vector<16xf32>
    %2 = vector.multi_reduction <maximumf>, %0, %cst [1] : vector<16x32xf32> to vector<16xf32>
    %3 = vector.shape_cast %2 : vector<16xf32> to vector<16x1xf32>
    %4 = vector.broadcast %3 : vector<16x1xf32> to vector<16x32xf32>
    %5 = arith.subf %0, %4 : vector<16x32xf32>
    %6 = math.exp %5 : vector<16x32xf32>
    %cst_3 = arith.constant dense<0.000000e+00> : vector<16xf32>
    %7 = vector.multi_reduction <add>, %6, %cst_3 [1] : vector<16x32xf32> to vector<16xf32>
    %8 = vector.shape_cast %7 : vector<16xf32> to vector<16x1xf32>
    %9 = math.log %8 : vector<16x1xf32>
    %10 = arith.addf %9, %3 : vector<16x1xf32>
    %cst_4 = arith.constant dense<0.000000e+00> : vector<16xf32>
    %11 = vector.multi_reduction <add>, %1, %cst_4 [1] : vector<16x32xf32> to vector<16xf32>
    %12 = vector.shape_cast %11 : vector<16xf32> to vector<16x1xf32>
    %13 = arith.mulf %1, %0 : vector<16x32xf32>
    %cst_5 = arith.constant dense<0.000000e+00> : vector<16xf32>
    %14 = vector.multi_reduction <add>, %13, %cst_5 [1] : vector<16x32xf32> to vector<16xf32>
    %15 = vector.shape_cast %14 : vector<16xf32> to vector<16x1xf32>
    %16 = arith.mulf %10, %12 : vector<16x1xf32>
    %17 = arith.subf %16, %15 : vector<16x1xf32>
    %c16_i32 = arith.constant 16 : i32
    %18 = arith.muli %arg0, %c16_i32 : i32
    %19 = tpu.iota {dimensions = array<i32: 0>} : vector<16x1xi32>
    %20 = vector.broadcast %18 : i32 to vector<16x1xi32>
    %21 = arith.addi %20, %19 : vector<16x1xi32>
    %c16_i32_6 = arith.constant 16 : i32
    %22 = vector.broadcast %c16_i32_6 : i32 to vector<16x1xi32>
    %23 = arith.cmpi slt, %21, %22 : vector<16x1xi32>
    %cst_7 = arith.constant 0.000000e+00 : f32
    %24 = vector.broadcast %cst_7 : f32 to vector<16x1xf32>
    %25 = arith.select %23, %17, %24 : vector<16x1xi1>, vector<16x1xf32>
    %26 = vector.shape_cast %25 : vector<16x1xf32> to vector<1x16x1xf32>
    %cst_8 = arith.constant dense<0.000000e+00> : vector<1xf32>
    %27 = vector.multi_reduction <add>, %26, %cst_8 [1, 2] : vector<1x16x1xf32> to vector<1xf32>
    %28 = vector.shape_cast %27 : vector<1xf32> to vector<1x1x1xf32>
    %29 = vector.extract %28[0, 0, 0] : f32 from vector<1x1x1xf32>
    %30 = vector.broadcast %29 : f32 to vector<1x8x128xf32>
    %c0_9 = arith.constant 0 : index
    %c0_10 = arith.constant 0 : index
    %c0_11 = arith.constant 0 : index
    %31 = vector.load %arg3[%c0_9, %c0_10, %c0_11] : memref<1x8x128xf32, #tpu.memory_space<vmem>>, vector<1x8x128xf32>
    tpu.vector_store %arg3[%c0_9, %c0_10, %c0_11], %30 {strides = array<i32>} : memref<1x8x128xf32, #tpu.memory_space<vmem>>, vector<1x8x128xf32>,
    return
  }
  func.func @transform_0(%arg0: i32) -> (i32, i32) {
    %c0_i32 = arith.constant 0 : i32
    %c0_i32_0 = arith.constant 0 : i32
    return %arg0, %c0_i32 : i32, i32
  }
  func.func @transform_1(%arg0: i32) -> (i32, i32) {
    %c0_i32 = arith.constant 0 : i32
    %c0_i32_0 = arith.constant 0 : i32
    return %arg0, %c0_i32 : i32, i32
  }
  func.func @transform_2(%arg0: i32) -> (i32, i32, i32) {
    %c0_i32 = arith.constant 0 : i32
    %c0_i32_0 = arith.constant 0 : i32
    %c0_i32_1 = arith.constant 0 : i32
    return %arg0, %c0_i32, %c0_i32_0 : i32, i32, i32
  }
}

</mosaic_0001>

<bundles_post_ra>
// kernel: tpu_custom_call.1
= control target key start
LH: loop header
LB: loop body
LE: loop exit
PB: predicated region body
PF: predicated region fallthrough
CT: control target
= control target key end

     0   :  { %7 = vsyncpa [#allocation3], 0  ;;  %s265_s0 = inlined_call_operand.hbm [shape: f32[16,32], index: 0, kind: input, shape index: {}]   ;;  %s266_s1 = inlined_call_operand.hbm [shape: f32[16,32], index: 1, kind: input, shape index: {}]   ;;  %s267_s2 = inlined_call_operand.hbm [shape: f32[1,8,128], index: 2, kind: output, shape index: {}]  }
   0x1   :  { %8 = vsyncpa [#allocation6], 0 }
   0x2   :  { %9 = vsyncpa [#allocation4], 0  ;;  %s14_s11 = sshll.u32 %s265_s0, 4  ;;  %s228_s12 = smov [#allocation2]   ;;  %s15_s11 = int_to_ptr.hbm [resolvable:$true] %s14_s11 }
   0x3   :  { %s16_s13 = sshll.u32 %s228_s12, 4  ;;  %s27_s16 = sshll.u32 %s266_s1, 4  ;;  %s17_s13 = int_to_ptr.vmem [resolvable:$true] %s16_s13  ;;  %s28_s16 = int_to_ptr.hbm [resolvable:$true] %s27_s16 }
   0x4   :  { %s229_s17 = smov 128   ;;  %s230_s18 = smov 8  }
   0x5   :  { %22 = dma.hbm_to_vmem [thread:$0]  %s15_s11, 256, %s17_s13, [#allocation3], %s229_s17, %s229_s17, %s230_s18  }
   0x6   :  { %s231_s19 = smov [#allocation5]  }
   0x7   :  { %s29_s20 = sshll.u32 %s231_s19, 4  ;;  %s30_s20 = int_to_ptr.vmem [resolvable:$true] %s29_s20 }
   0x8   :  { %35 = dma.hbm_to_vmem [thread:$0]  %s28_s16, 256, %s30_s20, [#allocation6], %s229_s17, %s229_s17, %s230_s18  }
   0x9   :  { %222 = dma.done.wait [#allocation3], 256  }
   0xa   :  { %223 = vsyncadd [#allocation3], 4294967040 }
   0xb   :  { %224 = dma.done.wait [#allocation6], 256  }
   0xc   :  { %225 = vsyncadd [#allocation6], 4294967040  ;;  %vm48_vm0 = vcmask 261120   ;;  %v44_v0 = vld [vmem:[#allocation2] sm:$0xff]  ;;  %v45_v2 = vld [vmem:[#allocation2 + $0x8] sm:$0xff]  ;;  %vm102_vm1 = vcmask 7168  }
   0xd   :  { %v49_v1 = vsel %vm48_vm0, %v44_v0, -inf  ;;  %v52_v3 = vsel %vm48_vm0, %v45_v2, -inf  ;;  %v46_v4 = vld [vmem:[#allocation5] sm:$0xff]  ;;  %v47_v8 = vld [vmem:[#allocation5 + $0x8] sm:$0xff]  ;;  %s232_s0 = smov [#allocation7]   ;;  %s124_s23 = sshll.u32 %s267_s2, 4  ;;  %s125_s23 = int_to_ptr.hbm [resolvable:$true] %s124_s23 }
   0xe   :  { %50 = vmax.xlane.f32.xlu0 %v49_v1  ;;  %v73_v5 = vsel %vm48_vm0, %v46_v4, 0.0  ;;  %v79_v6 = vmul.f32 %v46_v4, %v44_v0  ;;  %v76_v9 = vsel %vm48_vm0, %v47_v8, 0.0  ;;  %v80_v20 = vmul.f32 %v47_v8, %v45_v2  ;;  %s122_s1 = sshll.u32 %s232_s0, 4  ;;  %s123_s1 = int_to_ptr.vmem [resolvable:$true] %s122_s1 }
   0xf   :  { %74 = vadd.xlane.f32.xlu2 %v73_v5 }
  0x10   :  { %v81_v7 = vsel %vm48_vm0, %v79_v6, 0.0  ;;  %v84_v21 = vsel %vm48_vm0, %v80_v20, 0.0 }
  0x16   :  { %53 = vmax.xlane.f32.xlu0 %v52_v3 }
  0x17   :  { %77 = vadd.xlane.f32.xlu2 %v76_v9 }
  0x1e   :  { %82 = vadd.xlane.f32.xlu0 %v81_v7 }
  0x81   :  { %v51_v10 = vpop.xlane.xlu0 %50 }
  0x82   :  { %v55_v11 = vsub.f32 %v44_v0, %v51_v10  ;;  %v75_v24 = vpop.xlane.xlu2 %74 }
  0x84   :  { %v57_v12 = vmul.f32 1.442695, %v55_v11 }
  0x86   :  { %142 = vpow2.f32 %v57_v12 }
  0x89   :  { %v54_v13 = vpop.xlane.xlu0 %53 }
  0x8a   :  { %v56_v14 = vsub.f32 %v45_v2, %v54_v13  ;;  %v78_v32 = vpop.xlane.xlu2 %77 }
  0x8c   :  { %v143_v15 = vpop.eup %142  ;;  %v59_v16 = vmul.f32 1.442695, %v56_v14 }
  0x8d   :  { %v61_v17 = vsel %vm48_vm0, %v143_v15, 0.0 }
  0x8e   :  { %144 = vpow2.f32 %v59_v16  ;;  %62 = vadd.xlane.f32.xlu1 %v61_v17 }
  0x91   :  { %v83_v31 = vpop.xlane.xlu0 %82 }
  0x94   :  { %v145_v18 = vpop.eup %144 }
  0x95   :  { %v64_v19 = vsel %vm48_vm0, %v145_v18, 0.0 }
  0x96   :  { %65 = vadd.xlane.f32.xlu1 %v64_v19 }
  0x9e   :  { %85 = vadd.xlane.f32.xlu1 %v84_v21 }
 0x101   :  { %v63_v22 = vpop.xlane.xlu1 %62 }
 0x102   :  { %146 = vlog2.f32 %v63_v22 }
 0x108   :  { %v147_v23 = vpop.eup %146 }
 0x109   :  { %v68_v25 = vmul.f32 0.6931472, %v147_v23  ;;  %v66_v26 = vpop.xlane.xlu1 %65 }
 0x10a   :  { %148 = vlog2.f32 %v66_v26 }
 0x10b   :  { %v71_v27 = vadd.f32 %v68_v25, %v51_v10 }
 0x10d   :  { %v87_v30 = vmul.f32 %v75_v24, %v71_v27 }
 0x10f   :  { %v89_v35 = vsub.f32 %v87_v30, %v83_v31 }
 0x110   :  { %v149_v28 = vpop.eup %148 }
 0x111   :  { %v70_v29 = vmul.f32 0.6931472, %v149_v28  ;;  %v86_v34 = vpop.xlane.xlu1 %85  ;;  %v103_v38 = vsel %vm102_vm1, %v89_v35, 0.0 }
 0x113   :  { %v72_v33 = vadd.f32 %v70_v29, %v54_v13 }
 0x115   :  { %v88_v36 = vmul.f32 %v78_v32, %v72_v33 }
 0x117   :  { %v90_v37 = vsub.f32 %v88_v36, %v86_v34 }
 0x119   :  { %v104_v39 = vsel %vm102_vm1, %v90_v37, 0.0 }
 0x11a   :  { %v105_v40 = vadd.f32 %v104_v39, %v103_v38 }
 0x11c   :  { %106 = vadd.xlane.f32.xlu2 %v105_v40 }
 0x18f   :  { %v107_v41 = vpop.xlane.xlu2 %106 }
 0x190   :  { %v108_v42 = vrot.slane %v107_v41, 4 }
 0x192   :  { %v109_v43 = vadd.f32 %v108_v42, %v107_v41 }
 0x194   :  { %v110_v44 = vrot.slane %v109_v43, 2 }
 0x196   :  { %v111_v45 = vadd.f32 %v110_v44, %v109_v43 }
 0x198   :  { %v112_v46 = vrot.slane %v111_v45, 1 }
 0x19a   :  { %v113_v47 = vadd.f32 %v112_v46, %v111_v45 }
 0x19c   :  { %135 = vpush %v113_v47 }
 0x1cd   :  { %s136_s24 = spop %135 }
 0x1ce   :  { %v115_v48 = vstv %s136_s24 }
 0x1cf   :  { %116 = vst [vmem:[#allocation7] sm:$0xff] %v115_v48 }
 0x1d0   :  { %127 = dma.vmem_to_hbm [thread:$0]  %s123_s1, 128, %s125_s23, [#allocation4]  }
 0x1d1   :  { %226 = dma.done.wait [#allocation4], 128  }
 0x1d2   :  { %227 = vsyncadd [#allocation4], 4294967168 }
 0x1d3   :  { %132 = vsyncpa [#allocation3], 1 }
 0x1d4   :  { %133 = vsyncpa [#allocation6], 1 }
 0x1d5   :  { %134 = vsyncpa [#allocation4], 1 }

</bundles_post_ra>
